<compile_context>
chip_gen: v7x
topology: tpu7x:2x2x1
jax: 0.10.0
libtpu: 0.0.40
codegen_flags: <defaults>
</compile_context>

<pallas_src>
import functools

import jax
import jax.numpy as jnp
from jax.experimental import pallas as pl
from jax.experimental.pallas import tpu as pltpu

F_IN = 13   # input features (full last dim of x blocks -> no feature padding)
H1 = 64
H2 = 32
F_OUT = 1


def _mlp_kernel(x_ref, w1_ref, b1_ref, w2_ref, b2_ref, w3_ref, b3_ref, o_ref,
                *, relu_in_bf16):
    """One batch tile.  x_ref is [TB, 13] f32 straight from HBM (batch-major).

    All matmuls use bf16 MXU inputs with f32 accumulation.  The first layer is
    a last-with-last contraction so its result is already feature-major
    [64, TB] (batch on lanes); layers 2/3 are plain feature-major matmuls and
    the output tile [1, TB] is lane-dense (unmasked stores).
    """
    x = x_ref[...].astype(jnp.bfloat16)                                  # [TB, 13] bf16

    def act(h_f32, b_ref):
        h = h_f32 + b_ref[...]                                           # f32 bias add
        if relu_in_bf16:                                                 # v6e / v7x
            return jnp.maximum(h.astype(jnp.bfloat16), 0.0)
        return jnp.maximum(h, 0.0).astype(jnp.bfloat16)                  # v5e-safe path

    # h1[o, n] = sum_k w1[o, k] * x[n, k]   (contract last dims of both operands)
    h1 = jax.lax.dot_general(
        w1_ref[...], x, (((1,), (1,)), ((), ())),
        preferred_element_type=jnp.float32)                              # [64, TB] f32
    h1 = act(h1, b1_ref)                                                 # [64, TB] bf16

    h2 = jnp.dot(w2_ref[...], h1, preferred_element_type=jnp.float32)   # [32, TB] f32
    h2 = act(h2, b2_ref)                                                 # [32, TB] bf16

    out = jnp.dot(w3_ref[...], h2, preferred_element_type=jnp.float32)  # [ 1, TB] f32
    o_ref[...] = (out + b3_ref[...]).astype(o_ref.dtype)


def _round_up(n, m):
    return ((n + m - 1) // m) * m


def tabnet_forward(x, params, *, tb=8192, relu_in_bf16=True):
    """x: [B, 13] float32. params from init_params. Returns [B, 1] float32.

    Set relu_in_bf16=False on v5e (no bf16 VALU there).
    """
    B = x.shape[0]

    # Tile sizing: minimize batch padding, keep the tile a multiple of 256
    # lanes (N-dense for both the 128-wide v5e MXU and the 256-wide v6e/v7x
    # MXU), and use an even number of >= 2 grid steps once B is large enough so
    # the "parallel" batch axis actually feeds both TensorCores on v7x.
    n_tiles = pl.cdiv(B, tb)
    if B >= 512:
        n_tiles = max(n_tiles, 2)
        n_tiles += n_tiles % 2
    tb_eff = _round_up(pl.cdiv(B, n_tiles), 256)
    Bp = n_tiles * tb_eff

    # Only wrapper-side touch of x: pad ragged batch rows up to the tile grid.
    # This is a no-op (elided by XLA) whenever B is already a tile multiple;
    # feed tile-aligned batches upstream to avoid the copy entirely.
    if Bp != B:
        x = jnp.pad(x, ((0, Bp - B), (0, 0)))

    # Weights cast to bf16 once on the host (tiny, one-time); biases stay f32.
    w1 = params["w1"].astype(jnp.bfloat16)   # [64, 13]
    w2 = params["w2"].astype(jnp.bfloat16)   # [32, 64]
    w3 = params["w3"].astype(jnp.bfloat16)   # [ 1, 32]
    b1 = params["b1"]                        # [64, 1] f32
    b2 = params["b2"]                        # [32, 1] f32
    b3 = params["b3"]                        # [ 1, 1] f32

    # Constant index_map -> block never changes -> DMA'd into VMEM once.
    resident = lambda a: pl.BlockSpec(a.shape, lambda i: (0, 0))

    out_t = pl.pallas_call(
        functools.partial(_mlp_kernel, relu_in_bf16=relu_in_bf16),
        out_shape=jax.ShapeDtypeStruct((F_OUT, Bp), jnp.float32),
        grid=(n_tiles,),
        in_specs=[
            pl.BlockSpec((tb_eff, F_IN), lambda i: (i, 0)),  # x tile streams per step
            resident(w1), resident(b1),
            resident(w2), resident(b2),
            resident(w3), resident(b3),
        ],
        out_specs=pl.BlockSpec((F_OUT, tb_eff), lambda i: (0, i)),
        compiler_params=pltpu.CompilerParams(
            dimension_semantics=("parallel",),  # split batch tiles across TCs on v7x
        ),
    )(x, w1, b1, w2, b2, w3, b3)

    # Back to the module's [B, 1] output layout (tiny: B*4 bytes).
    return out_t[:, :B].T


def init_params(key):
    """PyTorch-native nn.Linear shapes ([out, in] weights, column biases)."""
    ks = jax.random.split(key, 6)

    def uniform_like_torch(k, shape, fan_in):
        bound = 1.0 / jnp.sqrt(fan_in)
        return jax.random.uniform(k, shape, jnp.float32, -bound, bound)

    return {
        "w1": uniform_like_torch(ks[0], (H1, F_IN), 13.0),
        "b1": uniform_like_torch(ks[1], (H1, 1), 13.0),
        "w2": uniform_like_torch(ks[2], (H2, H1), 64.0),
        "b2": uniform_like_torch(ks[3], (H2, 1), 64.0),
        "w3": uniform_like_torch(ks[4], (F_OUT, H2), 32.0),
        "b3": uniform_like_torch(ks[5], (F_OUT, 1), 32.0),
    }


def reference_forward(x, params):
    """Pure-JAX reference emulating bf16 MXU inputs with f32 accumulation."""
    c = lambda a: a.astype(jnp.bfloat16).astype(jnp.float32)
    h1 = jnp.maximum(c(x) @ c(params["w1"]).T + params["b1"].T, 0.0)
    h2 = jnp.maximum(c(h1) @ c(params["w2"]).T + params["b2"].T, 0.0)
    return c(h2) @ c(params["w3"]).T + params["b3"].T


if __name__ == "__main__":
    key = jax.random.PRNGKey(0)
    pkey, xkey = jax.random.split(key)
    params = init_params(pkey)

    # Tiny demo batch (the kernel pays off for B in the thousands; at B=8 the
    # fixed pallas_call overhead dominates — batch requests upstream in prod).
    B = 8
    x = jax.random.normal(xkey, (B, F_IN), jnp.float32)

    out = jax.block_until_ready(tabnet_forward(x, params))
    ref = reference_forward(x, params)

    assert out.shape == (B, 1), out.shape
    assert jnp.allclose(out, ref, atol=5e-3, rtol=5e-3), "mismatch vs JAX reference"

    print("KERNEL_OK")
</pallas_src>

<mosaic_0001>
module attributes {stable_mosaic.version = 11 : i64} {
  func.func @_mlp_kernel(%arg0: i32, %arg1: memref<256x13xf32, #tpu.memory_space<vmem>>, %arg2: memref<64x13xbf16, #tpu.memory_space<vmem>>, %arg3: memref<64x1xf32, #tpu.memory_space<vmem>>, %arg4: memref<32x64xbf16, #tpu.memory_space<vmem>>, %arg5: memref<32x1xf32, #tpu.memory_space<vmem>>, %arg6: memref<1x32xbf16, #tpu.memory_space<vmem>>, %arg7: memref<1x1xf32, #tpu.memory_space<vmem>>, %arg8: memref<1x256xf32, #tpu.memory_space<vmem>>) attributes {dimension_semantics = [#tpu.dimension_semantics<parallel>], iteration_bounds = array<i64: 1>, scalar_prefetch = 0 : i64, scratch_operands = 0 : i64, tpu.core_type = #tpu.core_type<tc>, window_params = [{transform_indices = @transform_0, window_bounds = array<i64: 256, 13>}, {pipeline_mode = #tpu.pipeline_mode<synchronous>, transform_indices = @transform_1, window_bounds = array<i64: 64, 13>}, {pipeline_mode = #tpu.pipeline_mode<synchronous>, transform_indices = @transform_2, window_bounds = array<i64: 64, 1>}, {pipeline_mode = #tpu.pipeline_mode<synchronous>, transform_indices = @transform_3, window_bounds = array<i64: 32, 64>}, {pipeline_mode = #tpu.pipeline_mode<synchronous>, transform_indices = @transform_4, window_bounds = array<i64: 32, 1>}, {pipeline_mode = #tpu.pipeline_mode<synchronous>, transform_indices = @transform_5, window_bounds = array<i64: 1, 32>}, {pipeline_mode = #tpu.pipeline_mode<synchronous>, transform_indices = @transform_6, window_bounds = array<i64: 1, 1>}, {transform_indices = @transform_7, window_bounds = array<i64: 1, 256>}]} {
    %c0 = arith.constant 0 : index
    %c0_0 = arith.constant 0 : index
    %0 = vector.load %arg1[%c0, %c0_0] : memref<256x13xf32, #tpu.memory_space<vmem>>, vector<256x13xf32>
    %1 = arith.truncf %0 : vector<256x13xf32> to vector<256x13xbf16>
    %c0_1 = arith.constant 0 : index
    %c0_2 = arith.constant 0 : index
    %2 = vector.load %arg2[%c0_1, %c0_2] : memref<64x13xbf16, #tpu.memory_space<vmem>>, vector<64x13xbf16>
    %cst = arith.constant dense<0.000000e+00> : vector<64x256xf32>
    %3 = tpu.matmul %2, %1, %cst {dimension_numbers = #tpu.dot_dimension_numbers<[1], [1], [0], [0], [0, 0, 1, 0], [], []>} : vector<64x13xbf16>, vector<256x13xbf16>, vector<64x256xf32> -> vector<64x256xf32>
    %c0_3 = arith.constant 0 : index
    %c0_4 = arith.constant 0 : index
    %4 = vector.load %arg3[%c0_3, %c0_4] : memref<64x1xf32, #tpu.memory_space<vmem>>, vector<64x1xf32>
    %5 = vector.broadcast %4 : vector<64x1xf32> to vector<64x256xf32>
    %6 = arith.addf %3, %5 : vector<64x256xf32>
    %7 = arith.truncf %6 : vector<64x256xf32> to vector<64x256xbf16>
    %cst_5 = arith.constant 0.000000e+00 : bf16
    %8 = vector.broadcast %cst_5 : bf16 to vector<64x256xbf16>
    %9 = arith.maximumf %7, %8 : vector<64x256xbf16>
    %c0_6 = arith.constant 0 : index
    %c0_7 = arith.constant 0 : index
    %10 = vector.load %arg4[%c0_6, %c0_7] : memref<32x64xbf16, #tpu.memory_space<vmem>>, vector<32x64xbf16>
    %cst_8 = arith.constant dense<0.000000e+00> : vector<32x256xf32>
    %11 = tpu.matmul %10, %9, %cst_8 {dimension_numbers = #tpu.dot_dimension_numbers<[1], [0], [0], [1], [0, 0, 1, 1], [], []>} : vector<32x64xbf16>, vector<64x256xbf16>, vector<32x256xf32> -> vector<32x256xf32>
    %c0_9 = arith.constant 0 : index
    %c0_10 = arith.constant 0 : index
    %12 = vector.load %arg5[%c0_9, %c0_10] : memref<32x1xf32, #tpu.memory_space<vmem>>, vector<32x1xf32>
    %13 = vector.broadcast %12 : vector<32x1xf32> to vector<32x256xf32>
    %14 = arith.addf %11, %13 : vector<32x256xf32>
    %15 = arith.truncf %14 : vector<32x256xf32> to vector<32x256xbf16>
    %cst_11 = arith.constant 0.000000e+00 : bf16
    %16 = vector.broadcast %cst_11 : bf16 to vector<32x256xbf16>
    %17 = arith.maximumf %15, %16 : vector<32x256xbf16>
    %c0_12 = arith.constant 0 : index
    %c0_13 = arith.constant 0 : index
    %18 = vector.load %arg6[%c0_12, %c0_13] : memref<1x32xbf16, #tpu.memory_space<vmem>>, vector<1x32xbf16>
    %cst_14 = arith.constant dense<0.000000e+00> : vector<1x256xf32>
    %19 = tpu.matmul %18, %17, %cst_14 {dimension_numbers = #tpu.dot_dimension_numbers<[1], [0], [0], [1], [0, 0, 1, 1], [], []>} : vector<1x32xbf16>, vector<32x256xbf16>, vector<1x256xf32> -> vector<1x256xf32>
    %c0_15 = arith.constant 0 : index
    %c0_16 = arith.constant 0 : index
    %20 = vector.load %arg7[%c0_15, %c0_16] : memref<1x1xf32, #tpu.memory_space<vmem>>, vector<1x1xf32>
    %21 = vector.broadcast %20 : vector<1x1xf32> to vector<1x256xf32>
    %22 = arith.addf %19, %21 : vector<1x256xf32>
    %c0_17 = arith.constant 0 : index
    %c0_18 = arith.constant 0 : index
    %23 = vector.load %arg8[%c0_17, %c0_18] : memref<1x256xf32, #tpu.memory_space<vmem>>, vector<1x256xf32>
    tpu.vector_store %arg8[%c0_17, %c0_18], %22 {strides = array<i32>} : memref<1x256xf32, #tpu.memory_space<vmem>>, vector<1x256xf32>,
    return
  }
  func.func @transform_0(%arg0: i32) -> (i32, i32) {
    %c0_i32 = arith.constant 0 : i32
    %c0_i32_0 = arith.constant 0 : i32
    return %arg0, %c0_i32 : i32, i32
  }
  func.func @transform_1(%arg0: i32) -> (i32, i32) {
    %c0_i32 = arith.constant 0 : i32
    %c0_i32_0 = arith.constant 0 : i32
    %c0_i32_1 = arith.constant 0 : i32
    return %c0_i32, %c0_i32_0 : i32, i32
  }
  func.func @transform_2(%arg0: i32) -> (i32, i32) {
    %c0_i32 = arith.constant 0 : i32
    %c0_i32_0 = arith.constant 0 : i32
    %c0_i32_1 = arith.constant 0 : i32
    return %c0_i32, %c0_i32_0 : i32, i32
  }
  func.func @transform_3(%arg0: i32) -> (i32, i32) {
    %c0_i32 = arith.constant 0 : i32
    %c0_i32_0 = arith.constant 0 : i32
    %c0_i32_1 = arith.constant 0 : i32
    return %c0_i32, %c0_i32_0 : i32, i32
  }
  func.func @transform_4(%arg0: i32) -> (i32, i32) {
    %c0_i32 = arith.constant 0 : i32
    %c0_i32_0 = arith.constant 0 : i32
    %c0_i32_1 = arith.constant 0 : i32
    return %c0_i32, %c0_i32_0 : i32, i32
  }
  func.func @transform_5(%arg0: i32) -> (i32, i32) {
    %c0_i32 = arith.constant 0 : i32
    %c0_i32_0 = arith.constant 0 : i32
    %c0_i32_1 = arith.constant 0 : i32
    return %c0_i32, %c0_i32_0 : i32, i32
  }
  func.func @transform_6(%arg0: i32) -> (i32, i32) {
    %c0_i32 = arith.constant 0 : i32
    %c0_i32_0 = arith.constant 0 : i32
    %c0_i32_1 = arith.constant 0 : i32
    return %c0_i32, %c0_i32_0 : i32, i32
  }
  func.func @transform_7(%arg0: i32) -> (i32, i32) {
    %c0_i32 = arith.constant 0 : i32
    %c0_i32_0 = arith.constant 0 : i32
    return %c0_i32, %arg0 : i32, i32
  }
}

</mosaic_0001>

<bundles_post_ra>
// kernel: tpu_custom_call.1
= control target key start
LH: loop header
LB: loop body
LE: loop exit
PB: predicated region body
PF: predicated region fallthrough
CT: control target
= control target key end

     0   :  { %s839_s0 = inlined_call_operand.vmem [shape: f32[256,13], index: 0, kind: input, shape index: {}]   ;;  %s840_s1 = inlined_call_operand.vmem [shape: bf16[64,13], index: 1, kind: input, shape index: {}]   ;;  %s841_s2 = inlined_call_operand.vmem [shape: f32[64,1], index: 2, kind: input, shape index: {}]   ;;  %s842_s3 = inlined_call_operand.vmem [shape: bf16[32,64], index: 3, kind: input, shape index: {}]   ;;  %s843_s4 = inlined_call_operand.vmem [shape: f32[32,1], index: 4, kind: input, shape index: {}]   ;;  %s844_s5 = inlined_call_operand.vmem [shape: bf16[1,32], index: 5, kind: input, shape index: {}]   ;;  %s845_s6 = inlined_call_operand.<no memory space> [shape: f32[1,1], index: 6, kind: input, shape index: {}]   ;;  %s846_s7 = inlined_call_operand.hbm [shape: f32[1,256], index: 7, kind: output, shape index: {}]  }
   0x1   :  { %v12_v0 = vstv %s845_s6 }
   0x2   :  { %13 = vst [vmem:[#allocation2] sm:$0x1] %v12_v0 }
   0x3   :  { %v46_v1 = vld [vmem:[%s839_s0 + $0x80] sm:$0xff]  ;;  %v47_v2 = vld [vmem:[%s839_s0 + $0x88] sm:$0xff]  ;;  %vm154_vm0 = vcmask 105472   ;;  %v48_v6 = vld [vmem:[%s839_s0 + $0x90] sm:$0xff]  ;;  %v583_v8 = vmov 0  }
   0x4   :  { %v30_v3 = vld [vmem:[%s839_s0] sm:$0xff]  ;;  %v70_v4 = vpack.c.bf16 %v47_v2, %v46_v1  ;;  %v31_v5 = vld [vmem:[%s839_s0 + $0x8] sm:$0xff]  ;;  %v49_v7 = vld [vmem:[%s839_s0 + $0x98] sm:$0xff]  ;;  %551 = vset.pattern.permute.xlu0 %v583_v8  ;;  %552 = vset.pattern.permute.xlu1 %v583_v8 }
   0x5   :  { %v62_v9 = vpack.c.bf16 %v31_v5, %v30_v3  ;;  %v71_v10 = vpack.c.bf16 %v49_v7, %v48_v6  ;;  %381 = vmatprep.mubr.bf16.mxu1 %v583_v8  ;;  %v32_v11 = vld [vmem:[%s839_s0 + $0x10] sm:$0xff]  ;;  %v33_v12 = vld [vmem:[%s839_s0 + $0x18] sm:$0xff]  ;;  %v50_v15 = vld [vmem:[%s839_s0 + $0xa0] sm:$0xff] }
   0x6   :  { %540 = vmatprep.subr.msk.bf16.mxu0 %vm154_vm0, %v70_v4  ;;  %v63_v14 = vpack.c.bf16 %v33_v12, %v32_v11  ;;  %v51_v16 = vld [vmem:[%s839_s0 + $0xa8] sm:$0xff]  ;;  %v34_v19 = vld [vmem:[%s839_s0 + $0x20] sm:$0xff]  ;;  %v52_v24 = vld [vmem:[%s839_s0 + $0xb0] sm:$0xff] }
   0x7   :  { %v168_v13 = vsel %vm154_vm0, %v62_v9, 0  ;;  %v72_v18 = vpack.c.bf16 %v51_v16, %v50_v15  ;;  %v35_v20 = vld [vmem:[%s839_s0 + $0x28] sm:$0xff]  ;;  %v675_v21 = vld [vmem:[%s840_s1] sm:$0xff]   ;;  %v53_v25 = vld [vmem:[%s839_s0 + $0xb8] sm:$0xff] }
   0x8   :  { %517 = vmatpush3.bf16.xpose.msra.mxu0 %v168_v13  ;;  %v171_v17 = vsel %vm154_vm0, %v63_v14, 0  ;;  %532 = vmatprep.mubr.msk.bf16.mxu0 %vm154_vm0, %v675_v21  ;;  %v64_v22 = vpack.c.bf16 %v35_v20, %v34_v19  ;;  %v86_v23 = vld [vmem:[%s841_s2] sm:$0xff]  ;;  %v88_v26 = vld [vmem:[%s841_s2 + $0x10] sm:$0xff]  ;;  %v87_v27 = vld [vmem:[%s841_s2 + $0x8] sm:$0xff]  ;;  %v73_v30 = vpack.c.bf16 %v53_v25, %v52_v24 }
   0x9   :  { %541 = vmatprep.subr.msk.bf16.mxu0 %vm154_vm0, %v71_v10  ;;  %96 = vperm.xlu0 %551, %v86_v23   ;;  %v89_v28 = vld [vmem:[%s841_s2 + $0x18] sm:$0xff]  ;;  %v36_v31 = vld [vmem:[%s839_s0 + $0x30] sm:$0xff]  ;;  %v90_v33 = vld [vmem:[%s841_s2 + $0x20] sm:$0xff] }
   0xa   :  { %106 = vperm.xlu1 %552, %v88_v26   ;;  %v174_v29 = vsel %vm154_vm0, %v64_v22, 0  ;;  %v37_v32 = vld [vmem:[%s839_s0 + $0x38] sm:$0xff] }
   0xd   :  { %101 = vperm.xlu0 %551, %v87_v27  }
   0xe   :  { %111 = vperm.xlu1 %552, %v89_v28  }
  0x10   :  { %519 = vmatpush3.bf16.xpose.msra.mxu0 %v171_v17 }
  0x11   :  { %542 = vmatprep.subr.msk.bf16.mxu0 %vm154_vm0, %v72_v18 }
  0x12   :  { %14 = vsyncpa [#allocation4], 0  ;;  %v91_v34 = vld [vmem:[%s841_s2 + $0x28] sm:$0xff]  ;;  %v65_v35 = vpack.c.bf16 %v37_v32, %v36_v31  ;;  %v54_v36 = vld [vmem:[%s839_s0 + $0xc0] sm:$0xff]  ;;  %116 = vperm.xlu0 %551, %v90_v33   ;;  %vm342_vm1 = vcmask 523264   ;;  %vm421_vm2 = vcmask 261120  }
  0x13   :  { %v55_v37 = vld [vmem:[%s839_s0 + $0xc8] sm:$0xff]  ;;  %v92_v38 = vld [vmem:[%s841_s2 + $0x30] sm:$0xff]  ;;  %121 = vperm.xlu1 %552, %v91_v34   ;;  %v93_v39 = vld [vmem:[%s841_s2 + $0x38] sm:$0xff]  ;;  %s585_s26 = smov [#allocation3]  }
  0x14   :  { %v177_v40 = vsel %vm154_vm0, %v65_v35, 0  ;;  %v74_v41 = vpack.c.bf16 %v55_v37, %v54_v36  ;;  %v38_v42 = vld [vmem:[%s839_s0 + $0x40] sm:$0xff]  ;;  %v39_v43 = vld [vmem:[%s839_s0 + $0x48] sm:$0xff]  ;;  %v56_v47 = vld [vmem:[%s839_s0 + $0xd0] sm:$0xff] }
  0x15   :  { %v308_v44 = vld [vmem:[%s843_s4] sm:$0xff]  ;;  %v309_v45 = vld [vmem:[%s843_s4 + $0x8] sm:$0xff]  ;;  %v66_v46 = vpack.c.bf16 %v39_v43, %v38_v42  ;;  %v57_v48 = vld [vmem:[%s839_s0 + $0xd8] sm:$0xff] }
  0x16   :  { %126 = vperm.xlu0 %551, %v92_v38   ;;  %v310_v49 = vld [vmem:[%s843_s4 + $0x10] sm:$0xff]  ;;  %v311_v50 = vld [vmem:[%s843_s4 + $0x18] sm:$0xff]  ;;  %v75_v52 = vpack.c.bf16 %v57_v48, %v56_v47  ;;  %v411_v55 = vld [vmem:[#allocation2] sm:$0x1] }
  0x17   :  { %131 = vperm.xlu1 %552, %v93_v39   ;;  %v180_v51 = vsel %vm154_vm0, %v66_v46, 0  ;;  %v40_v53 = vld [vmem:[%s839_s0 + $0x50] sm:$0xff]  ;;  %v41_v54 = vld [vmem:[%s839_s0 + $0x58] sm:$0xff]  ;;  %v58_v57 = vld [vmem:[%s839_s0 + $0xe0] sm:$0xff] }
  0x18   :  { %521 = vmatpush3.bf16.xpose.msra.mxu0 %v174_v29  ;;  %v67_v56 = vpack.c.bf16 %v41_v54, %v40_v53  ;;  %v59_v58 = vld [vmem:[%s839_s0 + $0xe8] sm:$0xff]  ;;  %v42_v61 = vld [vmem:[%s839_s0 + $0x60] sm:$0xff]  ;;  %v60_v0 = vld [vmem:[%s839_s0 + $0xf0] sm:$0xff] }
  0x19   :  { %543 = vmatprep.subr.msk.bf16.mxu0 %vm154_vm0, %v73_v30  ;;  %v76_v60 = vpack.c.bf16 %v59_v58, %v58_v57  ;;  %v43_v62 = vld [vmem:[%s839_s0 + $0x68] sm:$0xff]  ;;  %v61_v1 = vld [vmem:[%s839_s0 + $0xf8] sm:$0xff]  ;;  %v44_v4 = vld [vmem:[%s839_s0 + $0x70] sm:$0xff] }
  0x1a   :  { %314 = vperm.xlu0 %551, %v308_v44   ;;  %v183_v59 = vsel %vm154_vm0, %v67_v56, 0  ;;  %v68_v63 = vpack.c.bf16 %v43_v62, %v42_v61  ;;  %v77_v3 = vpack.c.bf16 %v61_v1, %v60_v0  ;;  %v45_v5 = vld [vmem:[%s839_s0 + $0x78] sm:$0xff]  ;;  %v554_v9 = vld [vmem:[%s840_s1 + $0x8] sm:$0xff]   ;;  %v555_v10 = vld [vmem:[%s840_s1 + $0x10] sm:$0xff]  }
  0x1b   :  { %319 = vperm.xlu1 %552, %v309_v45   ;;  %v69_v6 = vpack.c.bf16 %v45_v5, %v44_v4  ;;  %v556_v11 = vld [vmem:[%s840_s1 + $0x18] sm:$0xff]   ;;  %v557_v4 = vld [vmem:[%s842_s3] sm:$0xff]   ;;  %v558_v5 = vld [vmem:[%s842_s3 + $0x8] sm:$0xff]  }
  0x1c   :  { %v186_v2 = vsel %vm154_vm0, %v68_v63, 0 }
  0x1d   :  { %v189_v7 = vsel %vm154_vm0, %v69_v6, 0 }
  0x1e   :  { %324 = vperm.xlu0 %551, %v310_v49  }
  0x1f   :  { %329 = vperm.xlu1 %552, %v311_v50  }
  0x20   :  { %523 = vmatpush3.bf16.xpose.msra.mxu0 %v177_v40 }
  0x21   :  { %544 = vmatprep.subr.msk.bf16.mxu0 %vm154_vm0, %v74_v41 }
  0x22   :  { %414 = vperm.xlu0 %551, %v411_v55  }
  0x28   :  { %525 = vmatpush3.bf16.xpose.msra.mxu0 %v180_v51 }
  0x29   :  { %545 = vmatprep.subr.msk.bf16.mxu0 %vm154_vm0, %v75_v52 }
  0x30   :  { %527 = vmatpush3.bf16.xpose.msra.mxu0 %v183_v59 }
  0x31   :  { %546 = vmatprep.subr.msk.bf16.mxu0 %vm154_vm0, %v76_v60 }
  0x38   :  { %529 = vmatpush3.bf16.xpose.msra.mxu0 %v186_v2 }
  0x39   :  { %547 = vmatprep.subr.msk.bf16.mxu0 %vm154_vm0, %v77_v3 }
  0x40   :  { %531 = vmatpush3.bf16.xpose.msra.mxu0 %v189_v7 }
  0x47   :  { %533 = vmatmul.mubr.msk.bf16.vlgmr.msra.gmra.mrb[0].mxu0 %vm154_vm0, %v675_v21 }
  0x48   :  { %534 = vmatprep.mubr.msk.bf16.mxu0 %vm154_vm0, %v554_v9 }
  0x4f   :  { %535 = vmatmul.mubr.msk.bf16.gmra.mrb[4].mxu0 %vm154_vm0, %v554_v9 }
  0x50   :  { %536 = vmatprep.mubr.msk.bf16.mxu0 %vm154_vm0, %v555_v10 }
  0x57   :  { %537 = vmatmul.mubr.msk.bf16.gmra.mrb[8].mxu0 %vm154_vm0, %v555_v10 }
  0x58   :  { %538 = vmatprep.mubr.msk.bf16.mxu0 %vm154_vm0, %v556_v11 }
  0x5f   :  { %539 = vmatmul.mubr.msk.bf16.gmra.mrb[12].mxu0 %vm154_vm0, %v556_v11 }
  0x88   :  { %v97_v12 = vpop.permute.xlu0 %96 }
  0x89   :  { %v107_v20 = vpop.permute.xlu1 %106 }
  0x8c   :  { %v102_v15 = vpop.permute.xlu0 %101 }
  0x8d   :  { %v112_v29 = vpop.permute.xlu1 %111 }
  0x91   :  { %v117_v40 = vpop.permute.xlu0 %116 }
  0x92   :  { %v122_v43 = vpop.permute.xlu1 %121 }
  0x95   :  { %v127_v54 = vpop.permute.xlu0 %126 }
  0x96   :  { %v132_v57 = vpop.permute.xlu1 %131 }
  0x99   :  { %v315_v7 = vpop.permute.xlu0 %314 }
  0x9a   :  { %v320_v10 = vpop.permute.xlu1 %319 }
 0x11a   :  { %v249_v13 = vpop.f32.mrb[0].mxu0 }
 0x11b   :  { %v251_v14 = vpop.f32.mrb[1].mxu0  ;;  %v250_v17 = vadd.f32 %v249_v13, %v97_v12 }
 0x11c   :  { %v253_v16 = vpop.f32.mrb[2].mxu0  ;;  %v252_v21 = vadd.f32 %v251_v14, %v97_v12 }
 0x11d   :  { %v254_v18 = vadd.f32 %v253_v16, %v102_v15  ;;  %v255_v19 = vpop.f32.mrb[3].mxu0 }
 0x11e   :  { %v256_v22 = vadd.f32 %v255_v19, %v102_v15 }
 0x11f   :  { %v288_v23 = vpack.c.bf16 %v254_v18, %v250_v17 }
 0x120   :  { %v289_v24 = vpack.c.bf16 %v256_v22, %v252_v21  ;;  %v325_v21 = vpop.permute.xlu0 %324 }
 0x121   :  { %v296_v28 = vmax.bf16 %v583_v8, %v288_v23 }
 0x122   :  { %v259_v25 = vpop.f32.mrb[4].mxu0  ;;  %v297_v26 = vmax.bf16 %v583_v8, %v289_v24  ;;  %v330_v24 = vpop.permute.xlu1 %329 }
 0x123   :  { %v261_v27 = vpop.f32.mrb[5].mxu0  ;;  %v260_v31 = vadd.f32 %v259_v25, %v107_v20 }
 0x124   :  { %v263_v30 = vpop.f32.mrb[6].mxu0  ;;  %349 = vmatprep.subr.bf16.mxu1 %v297_v26  ;;  %v262_v34 = vadd.f32 %v261_v27, %v107_v20 }
 0x125   :  { %v264_v32 = vadd.f32 %v263_v30, %v112_v29  ;;  %v265_v33 = vpop.f32.mrb[7].mxu0  ;;  %350 = vmatpush1.bf16.msra.mxu1 %v296_v28 }
 0x126   :  { %v266_v35 = vadd.f32 %v265_v33, %v112_v29 }
 0x127   :  { %v290_v36 = vpack.c.bf16 %v264_v32, %v260_v31 }
 0x128   :  { %v291_v37 = vpack.c.bf16 %v266_v35, %v262_v34  ;;  %v410_v35 = vld [vmem:[%s844_s5] sm:$0x1]  ;;  %s495_s5 = sshll.u32 %s585_s26, 4  ;;  %s496_s5 = int_to_ptr.vmem [resolvable:$true] %s495_s5 }
 0x129   :  { %v298_v42 = vmax.bf16 %v583_v8, %v290_v36  ;;  %v417_v36 = vlaneseq  ;;  %s559_s27 = scalar_lea.vmem %s496_s5, 32  ;;  %p564_p1 = scmp.lt.s32.totalorder %s496_s5, %s496_s5 }
 0x12a   :  { %v269_v38 = vpop.f32.mrb[8].mxu0  ;;  %v299_v39 = vmax.bf16 %v583_v8, %v291_v37  ;;  %p560_p0 = scmp.ne.s32.totalorder %s496_s5, %s559_s27  ;;  %p565_p2 = scmp.lt.s32.totalorder %s559_s27, %s559_s27 }
 0x12b   :  { %v271_v41 = vpop.f32.mrb[9].mxu0  ;;  %v270_v45 = vadd.f32 %v269_v38, %v117_v40  ;;  %v418_v37 = vshrl.u32 %v417_v36, 7  ;;  %v584_v38 = vmov 1966171168   ;;  %vm486_vm3 = vcmp.lt.s32.totalorder %v417_v36, 256 }
 0x12c   :  { %v273_v44 = vpop.f32.mrb[10].mxu0  ;;  %351 = vmatprep.subr.bf16.mxu1 %v299_v39  ;;  %v272_v48 = vadd.f32 %v271_v41, %v117_v40  ;;  %v470_v39 = vunpack.c.l.s4 %v584_v38  ;;  %v415_v41 = vpop.permute.xlu0 %414  ;;  %p566_p3 = por %p565_p2, %p564_p1 }
 0x12d   :  { %v274_v46 = vadd.f32 %v273_v44, %v122_v43  ;;  %v275_v47 = vpop.f32.mrb[11].mxu0  ;;  %352 = vmatpush1.bf16.msra.mxu1 %v298_v42  ;;  %v419_v40 = vsub.s32 0, %v418_v37 }
 0x12e   :  { %v276_v49 = vadd.f32 %v275_v47, %v122_v43  ;;  %v471_v42 = vunpack.c.0.s8 %v470_v39  ;;  %p567_p4 = pnand %p566_p3, %p560_p0 }
 0x12f   :  { %v292_v50 = vpack.c.bf16 %v274_v46, %v270_v45  ;;  %v420_v43 = vrot.slane %v415_v41, %v419_v40 }
 0x130   :  { %v293_v51 = vpack.c.bf16 %v276_v49, %v272_v48  ;;  %v474_v47 = vsub.s32 %v471_v42, %v418_v37 }
 0x131   :  { %v300_v56 = vmax.bf16 %v583_v8, %v292_v50 }
 0x132   :  { %v279_v52 = vpop.f32.mrb[12].mxu0  ;;  %v301_v53 = vmax.bf16 %v583_v8, %v293_v51 }
 0x133   :  { %v281_v55 = vpop.f32.mrb[13].mxu0  ;;  %v280_v59 = vadd.f32 %v279_v52, %v127_v54 }
 0x134   :  { %v283_v58 = vpop.f32.mrb[14].mxu0  ;;  %353 = vmatprep.subr.bf16.mxu1 %v301_v53  ;;  %v282_v62 = vadd.f32 %v281_v55, %v127_v54 }
 0x135   :  { %v284_v60 = vadd.f32 %v283_v58, %v132_v57  ;;  %v285_v61 = vpop.f32.mrb[15].mxu0  ;;  %354 = vmatpush1.bf16.msra.mxu1 %v300_v56 }
 0x136   :  { %v286_v63 = vadd.f32 %v285_v61, %v132_v57 }
 0x137   :  { %v294_v0 = vpack.c.bf16 %v284_v60, %v280_v59 }
 0x138   :  { %v295_v1 = vpack.c.bf16 %v286_v63, %v282_v62 }
 0x139   :  { %v302_v3 = vmax.bf16 %v583_v8, %v294_v0 }
 0x13a   :  { %v303_v2 = vmax.bf16 %v583_v8, %v295_v1 }
 0x13c   :  { %355 = vmatprep.subr.bf16.mxu1 %v303_v2 }
 0x13d   :  { %356 = vmatpush1.bf16.msra.mxu1 %v302_v3 }
 0x140   :  { %513 = vmatmul.mubr.msk.bf16.vlgmr.msra.gmra.mrb[0].mxu1 %vm342_vm1, %v557_v4 }
 0x141   :  { %391 = vmatprep.mubr.bf16.mxu1 %v583_v8 }
 0x148   :  { %514 = vmatmul.mubr.msk.bf16.gmra.mrb[4].mxu1 %vm342_vm1, %v558_v5 }
 0x149   :  { %457 = vmatprep.mubr.bf16.mxu1 %v583_v8 }
 0x213   :  { %v383_v6 = vpop.f32.mrb[0].mxu1 }
 0x214   :  { %v385_v9 = vpop.f32.mrb[1].mxu1  ;;  %v384_v12 = vadd.f32 %v383_v6, %v315_v7 }
 0x215   :  { %v387_v11 = vpop.f32.mrb[2].mxu1  ;;  %v386_v15 = vadd.f32 %v385_v9, %v315_v7 }
 0x216   :  { %v388_v13 = vadd.f32 %v387_v11, %v320_v10  ;;  %v389_v14 = vpop.f32.mrb[3].mxu1 }
 0x217   :  { %v390_v16 = vadd.f32 %v389_v14, %v320_v10 }
 0x218   :  { %v402_v17 = vpack.c.bf16 %v388_v13, %v384_v12 }
 0x219   :  { %v403_v18 = vpack.c.bf16 %v390_v16, %v386_v15 }
 0x21a   :  { %v406_v22 = vmax.bf16 %v583_v8, %v402_v17 }
 0x21b   :  { %v393_v19 = vpop.f32.mrb[4].mxu1  ;;  %v407_v20 = vmax.bf16 %v583_v8, %v403_v18 }
 0x21c   :  { %v395_v23 = vpop.f32.mrb[5].mxu1  ;;  %v394_v26 = vadd.f32 %v393_v19, %v325_v21 }
 0x21d   :  { %v397_v25 = vpop.f32.mrb[6].mxu1  ;;  %425 = vmatprep.subr.bf16.mxu1 %v407_v20  ;;  %v396_v29 = vadd.f32 %v395_v23, %v325_v21 }
 0x21e   :  { %v398_v27 = vadd.f32 %v397_v25, %v330_v24  ;;  %v399_v28 = vpop.f32.mrb[7].mxu1  ;;  %426 = vmatpush1.bf16.msra.mxu1 %v406_v22 }
 0x21f   :  { %v400_v30 = vadd.f32 %v399_v28, %v330_v24 }
 0x220   :  { %v404_v31 = vpack.c.bf16 %v398_v27, %v394_v26 }
 0x221   :  { %v405_v32 = vpack.c.bf16 %v400_v30, %v396_v29 }
 0x222   :  { %v408_v34 = vmax.bf16 %v583_v8, %v404_v31 }
 0x223   :  { %v409_v33 = vmax.bf16 %v583_v8, %v405_v32 }
 0x225   :  { %427 = vmatprep.subr.bf16.mxu1 %v409_v33 }
 0x226   :  { %428 = vmatpush1.bf16.msra.mxu1 %v408_v34 }
 0x229   :  { %515 = vmatmul.mubr.msk.bf16.vlgmr.msra.gmra.mrb[8].mxu1 %vm421_vm2, %v410_v35 }
 0x2fc   :  { %v459_v44 = vpop.f32.mrb[8].mxu1 }
 0x2fd   :  { %v460_v45 = vadd.f32 %v459_v44, %v420_v43  ;;  %v461_v46 = vpop.f32.mrb[9].mxu1 }
 0x2fe   :  { %v462_v8 = vadd.f32 %v461_v46, %v420_v43  ;;  %v463_v48 = vpop.f32.mrb[10].mxu1 }
 0x2ff   :  { %v464_v49 = vpop.f32.mrb[11].mxu1 }
 0x300   :  { %v468_v50 = vcombine.low %v460_v45, %v462_v8 }
 0x302   :  { %v475_v51 = vrot.slane %v468_v50, %v474_v47 }
 0x304   :  { %v482_v52 = vrot.slane %v475_v51, %v474_v47 }
 0x306   :  { %488 = vst.msk [vmem:[#allocation3] sm:$0x3] %vm486_vm3, %v482_v52 }
 0x307   :  { %570 = shalt.err (!%p567_p4)
}
 0x308   :  { %s571_s29 = scalar_lea.hbm %s846_s7, 32 }
 0x309   :  { %p572_p5 = scmp.ne.s32.totalorder %s846_s7, %s571_s29  ;;  %p575_p6 = scmp.lt.u32.totalorder %s571_s29, %s846_s7 }
 0x30b   :  { %p577_p7 = pnand %p575_p6, %p572_p5 }
 0x30d   :  { %580 = shalt.err (!%p577_p7)
}
 0x30e   :  { %498 = dma.vmem_to_hbm [thread:$0]  %s496_s5, 32, %s846_s7, [#allocation4]  }
 0x30f   :  { %581 = dma.done.wait [#allocation4], 32  }
 0x310   :  { %582 = vsyncadd [#allocation4], 4294967264 }
 0x311   :  { %502 = vsyncpa [#allocation4], 1 }

</bundles_post_ra>
